<compile_context>
chip_gen: v6e
topology: v6e:2x2x1
jax: 0.10.0
libtpu: 0.0.40
codegen_flags: <defaults>
</compile_context>

<pallas_src>
import functools

import jax
import jax.numpy as jnp
from jax import lax
from jax.experimental import pallas as pl
from jax.experimental.pallas import tpu as pltpu

LANES = 128
SUBLANES = 8
MAX_ROW_TILE = 2048  # 2048 x 128 x 4B = 1 MiB f32 block per input


def _mse_kernel(yp_ref, y_ref, o_ref, acc_ref, *,
                total_n, row_tile, steps, needs_mask):
    c = pl.program_id(0)   # TensorCore split ("parallel")
    i = pl.program_id(1)   # streaming / reduction axis ("arbitrary")

    @pl.when(i == 0)
    def _init():
        acc_ref[...] = jnp.zeros_like(acc_ref)

    d = yp_ref[...].astype(jnp.float32) - y_ref[...].astype(jnp.float32)
    sq = d * d

    if needs_mask:
        # Mask out elements whose logical flat index is >= total_n
        # (tail padding / partial boundary block / clamped over-covered block).
        blk = c * steps + i
        row_ids = lax.broadcasted_iota(jnp.int32, (row_tile, LANES), 0)
        lane_ids = lax.broadcasted_iota(jnp.int32, (row_tile, LANES), 1)
        gidx = (blk * row_tile + row_ids) * LANES + lane_ids
        sq = jnp.where(gidx < total_n, sq, 0.0)

    # Lane/sublane-parallel accumulation (pure VPU, no per-step XLU reduce).
    acc_ref[...] = acc_ref[...] + sq

    @pl.when(i == steps - 1)
    def _finalize():
        # Single cross-lane reduce + scalar store per core-split.
        o_ref[...] = jnp.sum(acc_ref[...], keepdims=True)


def mse_loss(y_pred, y):
    """Pallas MSE loss: mean((y_pred - y)**2), matching nn.MSELoss()."""
    assert y_pred.shape == y.shape, "MSELoss requires matching shapes"
    total_n = y_pred.size

    flat_p = jnp.ravel(y_pred)
    flat_y = jnp.ravel(y)

    # Lane-dense 2-D slab (rows, 128); pad only if not already aligned to a
    # (8, 128) vreg multiple (the common NCHW f32 case needs no pad).
    rows = pl.cdiv(total_n, LANES)
    padded_rows = pl.cdiv(rows, SUBLANES) * SUBLANES
    padded_n = padded_rows * LANES
    if padded_n != total_n:
        flat_p = jnp.pad(flat_p, (0, padded_n - total_n))
        flat_y = jnp.pad(flat_y, (0, padded_n - total_n))
    yp2 = flat_p.reshape(padded_rows, LANES)
    y2 = flat_y.reshape(padded_rows, LANES)

    row_tile = min(MAX_ROW_TILE, padded_rows)          # multiple of 8
    num_blocks = pl.cdiv(padded_rows, row_tile)
    splits = 2 if num_blocks >= 2 else 1               # 2 TCs on v7x
    steps = pl.cdiv(num_blocks, splits)
    coverage = splits * steps * row_tile * LANES
    needs_mask = coverage != total_n
    last_block = num_blocks - 1

    def in_index_map(c, i):
        blk = c * steps + i
        if splits * steps != num_blocks:
            # Grid over-covers by at most one block: clamp so the DMA stays in
            # bounds; the in-kernel mask zeroes its contribution.
            blk = jnp.minimum(blk, last_block)
        return (blk, 0)

    kernel = functools.partial(
        _mse_kernel,
        total_n=total_n,
        row_tile=row_tile,
        steps=steps,
        needs_mask=needs_mask,
    )

    itemsize = jnp.dtype(y_pred.dtype).itemsize
    partials = pl.pallas_call(
        kernel,
        out_shape=jax.ShapeDtypeStruct((splits, 1), jnp.float32),
        grid_spec=pltpu.PrefetchScalarGridSpec(
            num_scalar_prefetch=0,
            grid=(splits, steps),
            in_specs=[
                pl.BlockSpec((row_tile, LANES), in_index_map),
                pl.BlockSpec((row_tile, LANES), in_index_map),
            ],
            out_specs=pl.BlockSpec((1, 1), lambda c, i: (c, 0)),
            scratch_shapes=[pltpu.VMEM((row_tile, LANES), jnp.float32)],
        ),
        compiler_params=pltpu.CompilerParams(
            dimension_semantics=("parallel", "arbitrary"),
        ),
        cost_estimate=pl.CostEstimate(
            flops=3 * total_n,
            transcendentals=0,
            bytes_accessed=2 * total_n * itemsize + splits * 4,
        ),
    )(yp2, y2)

    # Combine per-core partial sums and divide by the true element count.
    return jnp.sum(partials) / jnp.float32(total_n)


class BaseModel:
    """JAX/Pallas port of the PyTorch BaseModel."""

    def forward(self, x):
        # TODO(synk): BaseModel.forward raises NotImplementedError in the
        # reference; subclasses define it.  Identity used here so the
        # training/validation steps are exercisable.
        return x

    def __call__(self, x):
        return self.forward(x)

    def calculate_loss(self, y_pred, y):
        return mse_loss(y_pred, y)

    def training_step(self, batch):
        x, y = batch
        y_pred = self(x)
        return self.calculate_loss(y_pred, y)

    def validation_step(self, batch):
        x, y = batch
        y_pred = self(x)
        loss = self.calculate_loss(y_pred, y)
        # Return the device scalar directly (no blocking host sync).
        return {"val_loss": loss}


if __name__ == "__main__":
    key = jax.random.PRNGKey(0)
    kx, ky = jax.random.split(key)
    # NCHW example inputs consistent with a typical image regression model.
    x = jax.random.normal(kx, (2, 4, 16, 16), dtype=jnp.float32)
    y = jax.random.normal(ky, (2, 4, 16, 16), dtype=jnp.float32)

    model = BaseModel()
    loss = model.training_step((x, y))
    loss = jax.block_until_ready(loss)

    # Sanity check against plain-JAX reference.
    ref = jnp.mean((x - y) ** 2)
    assert jnp.allclose(loss, ref, rtol=1e-5, atol=1e-5), (loss, ref)

    val = model.validation_step((x, y))
    jax.block_until_ready(val["val_loss"])
    print("KERNEL_OK")
</pallas_src>

<mosaic_0001>
module attributes {stable_mosaic.version = 11 : i64} {
  func.func @_mse_kernel(%arg0: i32, %arg1: i32, %arg2: memref<16x128xf32, #tpu.memory_space<vmem>>, %arg3: memref<16x128xf32, #tpu.memory_space<vmem>>, %arg4: memref<1x1xf32, #tpu.memory_space<vmem>>, %arg5: memref<16x128xf32, #tpu.memory_space<vmem>>) attributes {dimension_semantics = [#tpu.dimension_semantics<parallel>, #tpu.dimension_semantics<arbitrary>], iteration_bounds = array<i64: 1, 1>, scalar_prefetch = 0 : i64, scratch_operands = 1 : i64, tpu.core_type = #tpu.core_type<tc>, window_params = [{transform_indices = @transform_0, window_bounds = array<i64: 16, 128>}, {transform_indices = @transform_1, window_bounds = array<i64: 16, 128>}, {transform_indices = @transform_2, window_bounds = array<i64: 1, 1>}]} {
    %c0_i32 = arith.constant 0 : i32
    %0 = arith.cmpi eq, %arg1, %c0_i32 : i32
    %1 = arith.extui %0 : i1 to i32
    %c0_i32_0 = arith.constant 0 : i32
    %2 = arith.cmpi ne, %1, %c0_i32_0 : i32
    scf.if %2 {
      %cst = arith.constant 0.000000e+00 : f32
      %13 = vector.broadcast %cst : f32 to vector<16x128xf32>
      %c0_10 = arith.constant 0 : index
      %c0_11 = arith.constant 0 : index
      %14 = vector.load %arg5[%c0_10, %c0_11] : memref<16x128xf32, #tpu.memory_space<vmem>>, vector<16x128xf32>
      tpu.vector_store %arg5[%c0_10, %c0_11], %13 {strides = array<i32>} : memref<16x128xf32, #tpu.memory_space<vmem>>, vector<16x128xf32>,
    } else {
    }
    %c0 = arith.constant 0 : index
    %c0_1 = arith.constant 0 : index
    %3 = vector.load %arg2[%c0, %c0_1] : memref<16x128xf32, #tpu.memory_space<vmem>>, vector<16x128xf32>
    %c0_2 = arith.constant 0 : index
    %c0_3 = arith.constant 0 : index
    %4 = vector.load %arg3[%c0_2, %c0_3] : memref<16x128xf32, #tpu.memory_space<vmem>>, vector<16x128xf32>
    %5 = arith.subf %3, %4 : vector<16x128xf32>
    %6 = arith.mulf %5, %5 : vector<16x128xf32>
    %c0_4 = arith.constant 0 : index
    %c0_5 = arith.constant 0 : index
    %7 = vector.load %arg5[%c0_4, %c0_5] : memref<16x128xf32, #tpu.memory_space<vmem>>, vector<16x128xf32>
    %8 = arith.addf %7, %6 : vector<16x128xf32>
    %c0_6 = arith.constant 0 : index
    %c0_7 = arith.constant 0 : index
    %9 = vector.load %arg5[%c0_6, %c0_7] : memref<16x128xf32, #tpu.memory_space<vmem>>, vector<16x128xf32>
    tpu.vector_store %arg5[%c0_6, %c0_7], %8 {strides = array<i32>} : memref<16x128xf32, #tpu.memory_space<vmem>>, vector<16x128xf32>,
    %c0_i32_8 = arith.constant 0 : i32
    %10 = arith.cmpi eq, %arg1, %c0_i32_8 : i32
    %11 = arith.extui %10 : i1 to i32
    %c0_i32_9 = arith.constant 0 : i32
    %12 = arith.cmpi ne, %11, %c0_i32_9 : i32
    scf.if %12 {
      %c0_10 = arith.constant 0 : index
      %c0_11 = arith.constant 0 : index
      %13 = vector.load %arg5[%c0_10, %c0_11] : memref<16x128xf32, #tpu.memory_space<vmem>>, vector<16x128xf32>
      %14 = vector.shape_cast %13 : vector<16x128xf32> to vector<1x16x128xf32>
      %cst = arith.constant dense<0.000000e+00> : vector<1xf32>
      %15 = vector.multi_reduction <add>, %14, %cst [1, 2] : vector<1x16x128xf32> to vector<1xf32>
      %16 = vector.shape_cast %15 : vector<1xf32> to vector<1x1x1xf32>
      %17 = vector.extract %16[0, 0, 0] : f32 from vector<1x1x1xf32>
      %18 = vector.broadcast %17 : f32 to vector<1x1xf32>
      %c0_12 = arith.constant 0 : index
      %c0_13 = arith.constant 0 : index
      %19 = vector.load %arg4[%c0_12, %c0_13] : memref<1x1xf32, #tpu.memory_space<vmem>>, vector<1x1xf32>
      tpu.vector_store %arg4[%c0_12, %c0_13], %18 {strides = array<i32>} : memref<1x1xf32, #tpu.memory_space<vmem>>, vector<1x1xf32>,
    } else {
    }
    return
  }
  func.func @transform_0(%arg0: i32, %arg1: i32) -> (i32, i32) {
    %c1_i32 = arith.constant 1 : i32
    %0 = arith.muli %arg0, %c1_i32 : i32
    %1 = arith.addi %0, %arg1 : i32
    %c0_i32 = arith.constant 0 : i32
    %c0_i32_0 = arith.constant 0 : i32
    return %1, %c0_i32 : i32, i32
  }
  func.func @transform_1(%arg0: i32, %arg1: i32) -> (i32, i32) {
    %c1_i32 = arith.constant 1 : i32
    %0 = arith.muli %arg0, %c1_i32 : i32
    %1 = arith.addi %0, %arg1 : i32
    %c0_i32 = arith.constant 0 : i32
    %c0_i32_0 = arith.constant 0 : i32
    return %1, %c0_i32 : i32, i32
  }
  func.func @transform_2(%arg0: i32, %arg1: i32) -> (i32, i32) {
    %c0_i32 = arith.constant 0 : i32
    %c0_i32_0 = arith.constant 0 : i32
    return %arg0, %c0_i32 : i32, i32
  }
}

</mosaic_0001>

<bundles_post_ra>
// kernel: tpu_custom_call.1
= control target key start
LH: loop header
LB: loop body
LE: loop exit
PB: predicated region body
PF: predicated region fallthrough
CT: control target
= control target key end

     0   :  { %7 = vsyncpa [#allocation4], 0  ;;  %s208_s0 = inlined_call_operand.hbm [shape: f32[16,128], index: 0, kind: input, shape index: {}]   ;;  %s209_s1 = inlined_call_operand.hbm [shape: f32[16,128], index: 1, kind: input, shape index: {}]   ;;  %s210_s2 = inlined_call_operand.hbm [shape: f32[1,1], index: 2, kind: output, shape index: {}]  }
   0x1   :  { %8 = vsyncpa [#allocation7], 0 }
   0x2   :  { %9 = vsyncpa [#allocation5], 0  ;;  %s179_s9 = smov [#allocation3]  }
   0x3   :  { %s19_s10 = sshll.u32 %s179_s9, 4  ;;  %s20_s10 = int_to_ptr.vmem [resolvable:$true] %s19_s10 }
   0x4   :  { %s121_s11 = scalar_lea.vmem %s20_s10, 256  ;;  %p126_p1 = scmp.lt.s32.totalorder %s20_s10, %s20_s10 }
   0x5   :  { %p122_p0 = scmp.ne.s32.totalorder %s20_s10, %s121_s11  ;;  %p127_p2 = scmp.lt.s32.totalorder %s121_s11, %s121_s11 }
   0x7   :  { %p128_p3 = por %p127_p2, %p126_p1 }
   0x9   :  { %p129_p4 = pnand %p128_p3, %p122_p0 }
   0xb   :  { %132 = shalt.err (!%p129_p4)
}
   0xc   :  { %s180_s12 = smov 128   ;;  %s181_s13 = smov 8  }
   0xd   :  { %25 = dma.hbm_to_vmem [thread:$0]  %s208_s0, 256, %s20_s10, [#allocation4], %s180_s12, %s180_s12, %s181_s13  }
   0xe   :  { %s182_s16 = smov [#allocation6]  }
   0xf   :  { %s35_s17 = sshll.u32 %s182_s16, 4  ;;  %s36_s17 = int_to_ptr.vmem [resolvable:$true] %s35_s17 }
  0x10   :  { %s141_s18 = scalar_lea.vmem %s36_s17, 256  ;;  %p146_p6 = scmp.lt.s32.totalorder %s36_s17, %s36_s17 }
  0x11   :  { %p142_p5 = scmp.ne.s32.totalorder %s36_s17, %s141_s18  ;;  %p147_p7 = scmp.lt.s32.totalorder %s141_s18, %s141_s18 }
  0x13   :  { %p148_p8 = por %p147_p7, %p146_p6 }
  0x15   :  { %p149_p9 = pnand %p148_p8, %p142_p5 }
  0x17   :  { %152 = shalt.err (!%p149_p9)
}
  0x18   :  { %41 = dma.hbm_to_vmem [thread:$0]  %s209_s1, 256, %s36_s17, [#allocation7], %s180_s12, %s180_s12, %s181_s13  }
  0x19   :  { %173 = dma.done.wait [#allocation4], 256  }
  0x1a   :  { %174 = vsyncadd [#allocation4], 4294967040 }
  0x1b   :  { %175 = dma.done.wait [#allocation7], 256  }
  0x1c   :  { %176 = vsyncadd [#allocation7], 4294967040  ;;  %v58_v0 = vld [vmem:[#allocation3] sm:$0xff]  ;;  %v59_v1 = vld [vmem:[#allocation3 + $0x8] sm:$0xff]  ;;  %s183_s0 = smov [#allocation8]   ;;  %vm88_vm0 = vcmask 0  }
  0x1d   :  { %v60_v2 = vld [vmem:[#allocation6] sm:$0xff]  ;;  %v61_v3 = vld [vmem:[#allocation6 + $0x8] sm:$0xff]  ;;  %s96_s1 = sshll.u32 %s183_s0, 4  ;;  %s97_s1 = int_to_ptr.vmem [resolvable:$true] %s96_s1 }
  0x1e   :  { %v62_v4 = vsub.f32 %v58_v0, %v60_v2  ;;  %v63_v5 = vsub.f32 %v59_v1, %v61_v3  ;;  %s153_s22 = scalar_lea.vmem %s97_s1, 16  ;;  %s157_s23 = scalar_lea.vmem %s97_s1, 32 }
  0x1f   :  { %p154_p10 = scmp.ne.s32.totalorder %s97_s1, %s153_s22  ;;  %p158_p11 = scmp.lt.s32.totalorder %s97_s1, %s97_s1 }
  0x20   :  { %v64_v6 = vmul.f32 %v62_v4, %v62_v4  ;;  %v65_v7 = vmul.f32 %v63_v5, %v63_v5  ;;  %p159_p12 = scmp.lt.s32.totalorder %s157_s23, %s153_s22 }
  0x22   :  { %v77_v8 = vadd.f32 %v65_v7, %v64_v6  ;;  %p160_p13 = por %p159_p12, %p158_p11 }
  0x24   :  { %78 = vadd.xlane.f32.xlu0 %v77_v8  ;;  %p161_p0 = pnand %p160_p13, %p154_p10 }
  0xad   :  { %v79_v9 = vpop.xlane.xlu0 %78 }
  0xae   :  { %v80_v10 = vrot.slane %v79_v9, 4 }
  0xb0   :  { %v81_v11 = vadd.f32 %v80_v10, %v79_v9 }
  0xb2   :  { %v82_v12 = vrot.slane %v81_v11, 2 }
  0xb4   :  { %v83_v13 = vadd.f32 %v82_v12, %v81_v11 }
  0xb6   :  { %v84_v14 = vrot.slane %v83_v13, 1 }
  0xb8   :  { %v85_v15 = vadd.f32 %v84_v14, %v83_v13 }
  0xba   :  { %106 = vpush %v85_v15 }
  0xeb   :  { %s107_s21 = spop %106 }
  0xec   :  { %v87_v16 = vstv %s107_s21 }
  0xed   :  { %89 = vst.msk [vmem:[#allocation8] sm:$0x1] %vm88_vm0, %v87_v16 }
  0xee   :  { %164 = shalt.err (!%p161_p0)
}
  0xef   :  { %99 = dma.vmem_to_hbm [thread:$0]  %s97_s1, 16, %s210_s2, [#allocation5]  }
  0xf0   :  { %177 = dma.done.wait [#allocation5], 16  }
  0xf1   :  { %178 = vsyncadd [#allocation5], 4294967280 }
  0xf2   :  { %103 = vsyncpa [#allocation4], 1 }
  0xf3   :  { %104 = vsyncpa [#allocation7], 1 }
  0xf4   :  { %105 = vsyncpa [#allocation5], 1 }

</bundles_post_ra>
